<compile_context>
chip_gen: v5e
topology: v5e:2x2
jax: 0.10.0
libtpu: 0.0.40
codegen_flags: <defaults>
</compile_context>

<pallas_src>
import jax
import jax.numpy as jnp
from jax.experimental import pallas as pl
from jax.experimental.pallas import tpu as pltpu


def _round_up(x, m):
    return (x + m - 1) // m * m


def critic_kernel(x_ref, w1_ref, b1_ref, w2_ref, b2_ref, o_ref):
    # x_ref : (S, TB)   batch on the lane axis
    # w1_ref: (H, S)    resident across grid steps
    # b1_ref: (H, 1)    resident
    # w2_ref: (H, 1)    resident
    # b2_ref: (1, 1)    SMEM scalar
    # o_ref : (1, TB)   lane-dense output tile
    h = jnp.dot(w1_ref[...], x_ref[...],
                preferred_element_type=jnp.float32)          # MXU: (H, TB), f32 acc
    h = jnp.maximum(h + b1_ref[...], 0.0)                    # VPU bias + ReLU
    v = jnp.sum(h * w2_ref[...], axis=0, keepdims=True)      # VPU mul + XLU reduce
    o_ref[...] = (v + b2_ref[0, 0]).astype(o_ref.dtype)      # unmasked lane-dense store


def critic_forward(x, w1, b1, w2, b2, *, block_batch=1024, use_bf16=False):
    """x: (B, S); w1: (H, S); b1: (H,); w2: (1, H); b2: (1,). Returns (B, 1)."""
    B, S = x.shape
    H = w1.shape[0]

    # Lane-dense batch tile: multiple of 128, capped at block_batch.
    TB = min(block_batch, _round_up(B, 128))
    B_pad = _round_up(B, TB)
    n_tiles = B_pad // TB

    # Wrapper-side layout plumbing (free relative to the kernel).
    xt = x.T                                                  # (S, B)
    if B_pad != B:
        xt = jnp.pad(xt, ((0, 0), (0, B_pad - B)))            # (S, B_pad)
    b1c = jnp.reshape(b1, (H, 1)).astype(jnp.float32)
    w2c = jnp.reshape(w2, (H, 1)).astype(jnp.float32)
    b2s = jnp.reshape(b2, (1, 1)).astype(jnp.float32)

    if use_bf16:  # v6e/v7x: bf16 MXU operands, f32 accumulation inside the kernel
        xt = xt.astype(jnp.bfloat16)
        w1 = w1.astype(jnp.bfloat16)
    else:
        xt = xt.astype(jnp.float32)
        w1 = w1.astype(jnp.float32)

    cost = pl.CostEstimate(
        flops=2 * B_pad * S * H + 3 * B_pad * H,
        transcendentals=0,
        bytes_accessed=4 * (S * B_pad + H * S + 2 * H + 1 + B_pad),
    )

    out = pl.pallas_call(
        critic_kernel,
        out_shape=jax.ShapeDtypeStruct((1, B_pad), jnp.float32),
        grid_spec=pltpu.PrefetchScalarGridSpec(
            num_scalar_prefetch=0,
            grid=(n_tiles,),
            in_specs=[
                pl.BlockSpec((S, TB), lambda i: (0, i)),       # x: batch-tiled
                pl.BlockSpec((H, S), lambda i: (0, 0)),        # w1: resident
                pl.BlockSpec((H, 1), lambda i: (0, 0)),        # b1: resident
                pl.BlockSpec((H, 1), lambda i: (0, 0)),        # w2: resident
                pl.BlockSpec((1, 1), lambda i: (0, 0),
                             memory_space=pltpu.MemorySpace.SMEM),  # b2 scalar
            ],
            out_specs=pl.BlockSpec((1, TB), lambda i: (0, i)),
        ),
        compiler_params=pltpu.CompilerParams(
            # Batch tiles are independent -> megacore sharding on v7x,
            # neutral on v5e/v6e.
            dimension_semantics=("parallel",),
            # NOTE: at S=16 / H=128 every tile fits trivially; for a much
            # larger critic, budget TB against v7x's 64 MiB VMEM (double
            # buffering of x and the output) or raise vmem_limit_bytes.
        ),
        cost_estimate=cost,
    )(xt, w1, b1c, w2c, b2s)

    return out[0, :B].reshape(B, 1)


def init_params(key, state_size, hidden_size):
    """Deterministic init mimicking nn.Linear's U(-1/sqrt(fan_in), +), torch layout."""
    k1, k2, k3, k4 = jax.random.split(key, 4)
    bnd1 = 1.0 / jnp.sqrt(jnp.float32(state_size))
    bnd2 = 1.0 / jnp.sqrt(jnp.float32(hidden_size))
    w1 = jax.random.uniform(k1, (hidden_size, state_size), jnp.float32, -bnd1, bnd1)
    b1 = jax.random.uniform(k2, (hidden_size,), jnp.float32, -bnd1, bnd1)
    w2 = jax.random.uniform(k3, (1, hidden_size), jnp.float32, -bnd2, bnd2)
    b2 = jax.random.uniform(k4, (1,), jnp.float32, -bnd2, bnd2)
    return w1, b1, w2, b2


if __name__ == "__main__":
    state_size = 16
    hidden_size = 128

    key = jax.random.PRNGKey(0)
    kx, kp, kx2 = jax.random.split(key, 3)
    w1, b1, w2, b2 = init_params(kp, state_size, hidden_size)

    def reference(x):
        return jnp.maximum(x @ w1.T + b1, 0.0) @ w2.T + b2

    # Small RL-style batch (single 128-wide tile, padded from 8).
    x = jax.random.normal(kx, (8, state_size), jnp.float32)
    out = jax.block_until_ready(critic_forward(x, w1, b1, w2, b2))
    assert out.shape == (8, 1)
    assert jnp.allclose(out, reference(x), atol=1e-5, rtol=1e-5)

    # Ragged batch exercising batch tiling + padding (3 tiles of 128).
    x2 = jax.random.normal(kx2, (300, state_size), jnp.float32)
    out2 = jax.block_until_ready(
        critic_forward(x2, w1, b1, w2, b2, block_batch=128))
    assert out2.shape == (300, 1)
    assert jnp.allclose(out2, reference(x2), atol=1e-5, rtol=1e-5)

    # bf16 operand path (v6e/v7x MXU fast path; f32 accumulation).
    out3 = jax.block_until_ready(
        critic_forward(x2, w1, b1, w2, b2, block_batch=128, use_bf16=True))
    assert out3.shape == (300, 1)
    assert jnp.allclose(out3, reference(x2), atol=1e-1, rtol=1e-1)

    print("KERNEL_OK")
</pallas_src>

<mosaic_0001>
module attributes {stable_mosaic.version = 11 : i64} {
  func.func @critic_kernel(%arg0: i32, %arg1: memref<16x128xf32, #tpu.memory_space<vmem>>, %arg2: memref<128x16xf32, #tpu.memory_space<vmem>>, %arg3: memref<128x1xf32, #tpu.memory_space<vmem>>, %arg4: memref<128x1xf32, #tpu.memory_space<vmem>>, %arg5: memref<1x1xf32, #tpu.memory_space<smem>>, %arg6: memref<1x128xf32, #tpu.memory_space<vmem>>) attributes {dimension_semantics = [#tpu.dimension_semantics<parallel>], iteration_bounds = array<i64: 1>, scalar_prefetch = 0 : i64, scratch_operands = 0 : i64, tpu.core_type = #tpu.core_type<tc>, window_params = [{transform_indices = @transform_0, window_bounds = array<i64: 16, 128>}, {pipeline_mode = #tpu.pipeline_mode<synchronous>, transform_indices = @transform_1, window_bounds = array<i64: 128, 16>}, {pipeline_mode = #tpu.pipeline_mode<synchronous>, transform_indices = @transform_2, window_bounds = array<i64: 128, 1>}, {pipeline_mode = #tpu.pipeline_mode<synchronous>, transform_indices = @transform_3, window_bounds = array<i64: 128, 1>}, {transform_indices = @transform_4, window_bounds = array<i64: 1, 1>}, {transform_indices = @transform_5, window_bounds = array<i64: 1, 128>}]} {
    %c0 = arith.constant 0 : index
    %c0_0 = arith.constant 0 : index
    %0 = vector.load %arg2[%c0, %c0_0] : memref<128x16xf32, #tpu.memory_space<vmem>>, vector<128x16xf32>
    %c0_1 = arith.constant 0 : index
    %c0_2 = arith.constant 0 : index
    %1 = vector.load %arg1[%c0_1, %c0_2] : memref<16x128xf32, #tpu.memory_space<vmem>>, vector<16x128xf32>
    %cst = arith.constant dense<0.000000e+00> : vector<128x128xf32>
    %2 = tpu.matmul %0, %1, %cst {dimension_numbers = #tpu.dot_dimension_numbers<[1], [0], [0], [1], [0, 0, 1, 1], [], []>} : vector<128x16xf32>, vector<16x128xf32>, vector<128x128xf32> -> vector<128x128xf32>
    %c0_3 = arith.constant 0 : index
    %c0_4 = arith.constant 0 : index
    %3 = vector.load %arg3[%c0_3, %c0_4] : memref<128x1xf32, #tpu.memory_space<vmem>>, vector<128x1xf32>
    %4 = vector.broadcast %3 : vector<128x1xf32> to vector<128x128xf32>
    %5 = arith.addf %2, %4 : vector<128x128xf32>
    %cst_5 = arith.constant 0.000000e+00 : f32
    %6 = vector.broadcast %cst_5 : f32 to vector<128x128xf32>
    %7 = arith.maximumf %5, %6 : vector<128x128xf32>
    %c0_6 = arith.constant 0 : index
    %c0_7 = arith.constant 0 : index
    %8 = vector.load %arg4[%c0_6, %c0_7] : memref<128x1xf32, #tpu.memory_space<vmem>>, vector<128x1xf32>
    %9 = vector.broadcast %8 : vector<128x1xf32> to vector<128x128xf32>
    %10 = arith.mulf %7, %9 : vector<128x128xf32>
    %cst_8 = arith.constant dense<0.000000e+00> : vector<128xf32>
    %11 = vector.multi_reduction <add>, %10, %cst_8 [0] : vector<128x128xf32> to vector<128xf32>
    %12 = vector.shape_cast %11 : vector<128xf32> to vector<1x128xf32>
    %c0_9 = arith.constant 0 : index
    %c0_10 = arith.constant 0 : index
    %13 = memref.load %arg5[%c0_9, %c0_10] : memref<1x1xf32, #tpu.memory_space<smem>>
    %14 = vector.broadcast %13 : f32 to vector<1x128xf32>
    %15 = arith.addf %12, %14 : vector<1x128xf32>
    %c0_11 = arith.constant 0 : index
    %c0_12 = arith.constant 0 : index
    %16 = vector.load %arg6[%c0_11, %c0_12] : memref<1x128xf32, #tpu.memory_space<vmem>>, vector<1x128xf32>
    tpu.vector_store %arg6[%c0_11, %c0_12], %15 {strides = array<i32>} : memref<1x128xf32, #tpu.memory_space<vmem>>, vector<1x128xf32>,
    return
  }
  func.func @transform_0(%arg0: i32) -> (i32, i32) {
    %c0_i32 = arith.constant 0 : i32
    %c0_i32_0 = arith.constant 0 : i32
    return %c0_i32, %arg0 : i32, i32
  }
  func.func @transform_1(%arg0: i32) -> (i32, i32) {
    %c0_i32 = arith.constant 0 : i32
    %c0_i32_0 = arith.constant 0 : i32
    %c0_i32_1 = arith.constant 0 : i32
    return %c0_i32, %c0_i32_0 : i32, i32
  }
  func.func @transform_2(%arg0: i32) -> (i32, i32) {
    %c0_i32 = arith.constant 0 : i32
    %c0_i32_0 = arith.constant 0 : i32
    %c0_i32_1 = arith.constant 0 : i32
    return %c0_i32, %c0_i32_0 : i32, i32
  }
  func.func @transform_3(%arg0: i32) -> (i32, i32) {
    %c0_i32 = arith.constant 0 : i32
    %c0_i32_0 = arith.constant 0 : i32
    %c0_i32_1 = arith.constant 0 : i32
    return %c0_i32, %c0_i32_0 : i32, i32
  }
  func.func @transform_4(%arg0: i32) -> (i32, i32) {
    %c0_i32 = arith.constant 0 : i32
    %c0_i32_0 = arith.constant 0 : i32
    %c0_i32_1 = arith.constant 0 : i32
    return %c0_i32, %c0_i32_0 : i32, i32
  }
  func.func @transform_5(%arg0: i32) -> (i32, i32) {
    %c0_i32 = arith.constant 0 : i32
    %c0_i32_0 = arith.constant 0 : i32
    return %c0_i32, %arg0 : i32, i32
  }
}

</mosaic_0001>

<bundles_post_ra>
// kernel: tpu_custom_call.1
= control target key start
LH: loop header
LB: loop body
LE: loop exit
PB: predicated region body
PF: predicated region fallthrough
CT: control target
= control target key end

     0   :  { %v472_v1 = vmov 0   ;;  %vm136_vm0 = vcmask 130048   ;;  %s691_s0 = inlined_call_operand.vmem [shape: f32[16,128], index: 0, kind: input, shape index: {}]   ;;  %s692_s1 = inlined_call_operand.vmem [shape: f32[128,16], index: 1, kind: input, shape index: {}]   ;;  %s693_s2 = inlined_call_operand.vmem [shape: f32[128,1], index: 2, kind: input, shape index: {}]   ;;  %s694_s3 = inlined_call_operand.vmem [shape: f32[128,1], index: 3, kind: input, shape index: {}]   ;;  %s695_s4 = inlined_call_operand.<no memory space> [shape: f32[1,1], index: 4, kind: input, shape index: {}]   ;;  %s696_s5 = inlined_call_operand.hbm [shape: f32[1,128], index: 5, kind: output, shape index: {}]  }
   0x1   :  { %v39_v0 = vld [vmem:[%s691_s0 + $0x8] sm:$0xff]  ;;  %445 = vset.pattern.permute.xlu2 %v472_v1  ;;  %444 = vset.pattern.permute.xlu1 %v472_v1  ;;  %v44_v2 = vld [vmem:[%s693_s2 + $0x20] sm:$0xff]  ;;  %v42_v3 = vld [vmem:[%s693_s2 + $0x10] sm:$0xff] }
   0x2   :  { %443 = vset.pattern.permute.xlu0 %v472_v1  ;;  %199 = vmatpush.msra.mxu0 %v39_v0  ;;  %v40_v4 = vld [vmem:[%s693_s2] sm:$0xff]  ;;  %v45_v10 = vld [vmem:[%s693_s2 + $0x28] sm:$0xff]  ;;  %v43_v11 = vld [vmem:[%s693_s2 + $0x18] sm:$0xff] }
   0x3   :  { %435 = vmatpush.msra.mxu1 %v39_v0  ;;  %436 = vmatpush.msra.mxu2 %v39_v0  ;;  %v38_v5 = vld [vmem:[%s691_s0] sm:$0xff]  ;;  %v41_v12 = vld [vmem:[%s693_s2 + $0x8] sm:$0xff] }
   0x4   :  { %437 = vmatpush.msra.mxu3 %v39_v0  ;;  %78 = vperm.xlu2 %445, %v44_v2   ;;  %v22_v6 = vld [vmem:[%s692_s1] sm:$0xff] }
   0x5   :  { %68 = vperm.xlu1 %444, %v42_v3   ;;  %58 = vperm.xlu0 %443, %v40_v4   ;;  %v26_v7 = vld [vmem:[%s692_s1 + $0x20] sm:$0xff] }
   0x6   :  { %200 = vmatpush.msra.mxu0 %v38_v5  ;;  %438 = vmatpush.msra.mxu1 %v38_v5  ;;  %v30_v8 = vld [vmem:[%s692_s1 + $0x40] sm:$0xff] }
   0x7   :  { %v34_v9 = vld [vmem:[%s692_s1 + $0x60] sm:$0xff]  ;;  %439 = vmatpush.msra.mxu2 %v38_v5  ;;  %440 = vmatpush.msra.mxu3 %v38_v5 }
   0x8   :  { %419 = vmatmul.msk.f32.vlgmr.msra.gmra.mxu0 %vm136_vm0, %v22_v6  ;;  %423 = vmatmul.msk.f32.vlgmr.msra.gmra.mxu1 %vm136_vm0, %v26_v7 }
   0x9   :  { %427 = vmatmul.msk.f32.vlgmr.msra.gmra.mxu2 %vm136_vm0, %v30_v8  ;;  %431 = vmatmul.msk.f32.vlgmr.msra.gmra.mxu3 %vm136_vm0, %v34_v9 }
   0xa   :  { %11 = vsyncpa [#allocation4], 0  ;;  %v23_v13 = vld [vmem:[%s692_s1 + $0x8] sm:$0xff]  ;;  %v48_v17 = vld [vmem:[%s693_s2 + $0x40] sm:$0xff]  ;;  %s473_s12 = smov [#allocation3]   ;;  %s410_s16 = sshll.u32 %s696_s5, 4  ;;  %s411_s16 = int_to_ptr.hbm [resolvable:$true] %s410_s16 }
   0xb   :  { %v27_v14 = vld [vmem:[%s692_s1 + $0x28] sm:$0xff]  ;;  %v47_v18 = vld [vmem:[%s693_s2 + $0x38] sm:$0xff]  ;;  %v46_v19 = vld [vmem:[%s693_s2 + $0x30] sm:$0xff]  ;;  %s408_s13 = sshll.u32 %s473_s12, 4  ;;  %s409_s13 = int_to_ptr.vmem [resolvable:$true] %s408_s13 }
   0xc   :  { %83 = vperm.xlu2 %445, %v45_v10   ;;  %v31_v15 = vld [vmem:[%s692_s1 + $0x48] sm:$0xff]  ;;  %v24_v20 = vld [vmem:[%s692_s1 + $0x10] sm:$0xff]  ;;  %v51_v24 = vld [vmem:[%s693_s2 + $0x58] sm:$0xff] }
   0xd   :  { %73 = vperm.xlu1 %444, %v43_v11   ;;  %63 = vperm.xlu0 %443, %v41_v12   ;;  %v35_v16 = vld [vmem:[%s692_s1 + $0x68] sm:$0xff]  ;;  %v28_v21 = vld [vmem:[%s692_s1 + $0x30] sm:$0xff]  ;;  %v25_v27 = vld [vmem:[%s692_s1 + $0x18] sm:$0xff] }
   0xe   :  { %v32_v22 = vld [vmem:[%s692_s1 + $0x50] sm:$0xff]  ;;  %v49_v26 = vld [vmem:[%s693_s2 + $0x48] sm:$0xff]  ;;  %v29_v28 = vld [vmem:[%s692_s1 + $0x38] sm:$0xff] }
   0xf   :  { %v36_v23 = vld [vmem:[%s692_s1 + $0x70] sm:$0xff]  ;;  %v33_v29 = vld [vmem:[%s692_s1 + $0x58] sm:$0xff]  ;;  %v53_v32 = vld [vmem:[%s693_s2 + $0x68] sm:$0xff] }
  0x10   :  { %420 = vmatmul.msk.f32.gmra.mxu0 %vm136_vm0, %v23_v13  ;;  %424 = vmatmul.msk.f32.gmra.mxu1 %vm136_vm0, %v27_v14  ;;  %v50_v25 = vld [vmem:[%s693_s2 + $0x50] sm:$0xff]  ;;  %v37_v30 = vld [vmem:[%s692_s1 + $0x78] sm:$0xff]  ;;  %v52_v33 = vld [vmem:[%s693_s2 + $0x60] sm:$0xff] }
  0x11   :  { %428 = vmatmul.msk.f32.gmra.mxu2 %vm136_vm0, %v31_v15  ;;  %432 = vmatmul.msk.f32.gmra.mxu3 %vm136_vm0, %v35_v16  ;;  %v54_v31 = vld [vmem:[%s693_s2 + $0x70] sm:$0xff]  ;;  %v267_v34 = vld [vmem:[%s694_s3 + $0x8] sm:$0xff]  ;;  %v266_v35 = vld [vmem:[%s694_s3] sm:$0xff] }
  0x12   :  { %v55_v36 = vld [vmem:[%s693_s2 + $0x78] sm:$0xff]  ;;  %v270_v37 = vld [vmem:[%s694_s3 + $0x20] sm:$0xff]  ;;  %v268_v39 = vld [vmem:[%s694_s3 + $0x10] sm:$0xff] }
  0x13   :  { %v269_v38 = vld [vmem:[%s694_s3 + $0x18] sm:$0xff]  ;;  %v272_v41 = vld [vmem:[%s694_s3 + $0x30] sm:$0xff]  ;;  %v271_v42 = vld [vmem:[%s694_s3 + $0x28] sm:$0xff] }
  0x14   :  { %98 = vperm.xlu2 %445, %v48_v17   ;;  %v273_v40 = vld [vmem:[%s694_s3 + $0x38] sm:$0xff]  ;;  %v276_v43 = vld [vmem:[%s694_s3 + $0x50] sm:$0xff]  ;;  %v275_v44 = vld [vmem:[%s694_s3 + $0x48] sm:$0xff] }
  0x15   :  { %93 = vperm.xlu1 %444, %v47_v18   ;;  %88 = vperm.xlu0 %443, %v46_v19   ;;  %v274_v45 = vld [vmem:[%s694_s3 + $0x40] sm:$0xff]  ;;  %v279_v46 = vld [vmem:[%s694_s3 + $0x68] sm:$0xff]  ;;  %v277_v48 = vld [vmem:[%s694_s3 + $0x58] sm:$0xff] }
  0x16   :  { %v278_v47 = vld [vmem:[%s694_s3 + $0x60] sm:$0xff]  ;;  %v281_v49 = vld [vmem:[%s694_s3 + $0x78] sm:$0xff]  ;;  %v280_v50 = vld [vmem:[%s694_s3 + $0x70] sm:$0xff] }
  0x18   :  { %421 = vmatmul.msk.f32.gmra.mxu0 %vm136_vm0, %v24_v20  ;;  %425 = vmatmul.msk.f32.gmra.mxu1 %vm136_vm0, %v28_v21 }
  0x19   :  { %429 = vmatmul.msk.f32.gmra.mxu2 %vm136_vm0, %v32_v22  ;;  %433 = vmatmul.msk.f32.gmra.mxu3 %vm136_vm0, %v36_v23 }
  0x1c   :  { %113 = vperm.xlu2 %445, %v51_v24  }
  0x1d   :  { %108 = vperm.xlu1 %444, %v50_v25   ;;  %103 = vperm.xlu0 %443, %v49_v26  }
  0x20   :  { %422 = vmatmul.msk.f32.gmra.mxu0 %vm136_vm0, %v25_v27  ;;  %426 = vmatmul.msk.f32.gmra.mxu1 %vm136_vm0, %v29_v28 }
  0x21   :  { %430 = vmatmul.msk.f32.gmra.mxu2 %vm136_vm0, %v33_v29  ;;  %434 = vmatmul.msk.f32.gmra.mxu3 %vm136_vm0, %v37_v30 }
  0x24   :  { %128 = vperm.xlu2 %445, %v54_v31  }
  0x25   :  { %123 = vperm.xlu1 %444, %v53_v32   ;;  %118 = vperm.xlu0 %443, %v52_v33  }
  0x2c   :  { %289 = vperm.xlu2 %445, %v267_v34  }
  0x2d   :  { %284 = vperm.xlu1 %444, %v266_v35   ;;  %133 = vperm.xlu0 %443, %v55_v36  }
  0x34   :  { %304 = vperm.xlu2 %445, %v270_v37  }
  0x35   :  { %299 = vperm.xlu1 %444, %v269_v38   ;;  %294 = vperm.xlu0 %443, %v268_v39  }
  0x3c   :  { %319 = vperm.xlu2 %445, %v273_v40  }
  0x3d   :  { %314 = vperm.xlu1 %444, %v272_v41   ;;  %309 = vperm.xlu0 %443, %v271_v42  }
  0x44   :  { %334 = vperm.xlu2 %445, %v276_v43  }
  0x45   :  { %329 = vperm.xlu1 %444, %v275_v44   ;;  %324 = vperm.xlu0 %443, %v274_v45  }
  0x4c   :  { %349 = vperm.xlu2 %445, %v279_v46  }
  0x4d   :  { %344 = vperm.xlu1 %444, %v278_v47   ;;  %339 = vperm.xlu0 %443, %v277_v48  }
  0x55   :  { %359 = vperm.xlu1 %444, %v281_v49   ;;  %354 = vperm.xlu0 %443, %v280_v50  }
  0x5e   :  { %v79_v51 = vpop.permute.xlu2 %78 }
  0x66   :  { %v84_v52 = vpop.permute.xlu2 %83 }
  0x6e   :  { %v99_v55 = vpop.permute.xlu2 %98 }
  0x76   :  { %v670_v59 = vpop.permute.xlu2 %113 }
  0x77   :  { %v69_v53 = vpop.permute.xlu1 %68  ;;  %v59_v54 = vpop.permute.xlu0 %58 }
  0x7e   :  { %v672_v2 = vpop.permute.xlu2 %128 }
  0x7f   :  { %v74_v56 = vpop.permute.xlu1 %73  ;;  %v64_v57 = vpop.permute.xlu0 %63 }
  0x85   :  { %v202_v58 = vpop.f32.mrf.mxu0  ;;  %v214_v62 = vpop.f32.mrf.mxu1 }
  0x86   :  { %v290_v8 = vpop.permute.xlu2 %289  ;;  %v203_v9 = vadd.f32 %v202_v58, %v59_v54  ;;  %v215_v27 = vadd.f32 %v214_v62, %v79_v51 }
  0x87   :  { %v94_v60 = vpop.permute.xlu1 %93  ;;  %v89_v61 = vpop.permute.xlu0 %88 }
  0x88   :  { %v250_v15 = vmax.f32 %v203_v9, 0.0  ;;  %v254_v35 = vmax.f32 %v215_v27, 0.0 }
  0x8c   :  { %v226_v7 = vpop.f32.mrf.mxu2  ;;  %v238_v16 = vpop.f32.mrf.mxu3 }
  0x8d   :  { %v205_v63 = vpop.f32.mrf.mxu0  ;;  %v217_v3 = vpop.f32.mrf.mxu1  ;;  %v227_v49 = vadd.f32 %v226_v7, %v99_v55 }
  0x8e   :  { %v206_v10 = vadd.f32 %v205_v63, %v64_v57  ;;  %v305_v20 = vpop.permute.xlu2 %304  ;;  %v218_v31 = vadd.f32 %v217_v3, %v84_v52 }
  0x8f   :  { %v109_v0 = vpop.permute.xlu1 %108  ;;  %v104_v1 = vpop.permute.xlu0 %103  ;;  %v366_v41 = vmul.f32 %v305_v20, %v254_v35 }
  0x90   :  { %v251_v17 = vmax.f32 %v206_v10, 0.0  ;;  %v255_v40 = vmax.f32 %v218_v31, 0.0 }
  0x92   :  { %v363_v23 = vmul.f32 %v290_v8, %v251_v17 }
  0x94   :  { %v229_v18 = vpop.f32.mrf.mxu2  ;;  %v241_v36 = vpop.f32.mrf.mxu3 }
  0x95   :  { %v208_v4 = vpop.f32.mrf.mxu0  ;;  %v220_v13 = vpop.f32.mrf.mxu1 }
  0x96   :  { %v209_v19 = vadd.f32 %v208_v4, %v69_v53  ;;  %v221_v37 = vadd.f32 %v220_v13, %v89_v61  ;;  %v320_v42 = vpop.permute.xlu2 %319  ;;  %v230_v53 = vadd.f32 %v229_v18, %v104_v1 }
  0x97   :  { %v674_v5 = vpop.permute.xlu1 %123  ;;  %v676_v6 = vpop.permute.xlu0 %118 }
  0x98   :  { %v252_v24 = vmax.f32 %v209_v19, 0.0  ;;  %v256_v46 = vmax.f32 %v221_v37, 0.0  ;;  %v259_v4 = vmax.f32 %v230_v53, 0.0  ;;  %v239_v13 = vadd.f32 %v238_v16, %v676_v6 }
  0x99   :  { %v242_v18 = vadd.f32 %v241_v36, %v674_v5 }
  0x9a   :  { %v262_v19 = vmax.f32 %v239_v13, 0.0 }
  0x9c   :  { %v232_v38 = vpop.f32.mrf.mxu2  ;;  %v244_v58 = vpop.f32.mrf.mxu3 }
  0x9d   :  { %v211_v14 = vpop.f32.mrf.mxu0  ;;  %v223_v34 = vpop.f32.mrf.mxu1  ;;  %v233_v57 = vadd.f32 %v232_v38, %v109_v0 }
  0x9e   :  { %v212_v21 = vadd.f32 %v211_v14, %v74_v56  ;;  %v224_v43 = vadd.f32 %v223_v34, %v94_v60  ;;  %v258_v56 = vmax.f32 %v227_v49, 0.0  ;;  %v335_v9 = vpop.permute.xlu2 %334 }
  0x9f   :  { %v285_v11 = vpop.permute.xlu1 %284  ;;  %v678_v12 = vpop.permute.xlu0 %133  ;;  %v260_v10 = vmax.f32 %v233_v57, 0.0 }
  0xa0   :  { %v362_v22 = vmul.f32 %v285_v11, %v250_v15  ;;  %v253_v28 = vmax.f32 %v212_v21, 0.0  ;;  %v257_v50 = vmax.f32 %v224_v43, 0.0 }
  0xa1   :  { %v372_v14 = vmul.f32 %v335_v9, %v260_v10 }
  0xa2   :  { %v378_v29 = vadd.f32 %v363_v23, %v362_v22  ;;  %v369_v61 = vmul.f32 %v320_v42, %v257_v50  ;;  %v245_v23 = vadd.f32 %v244_v58, %v672_v2 }
  0xa4   :  { %v235_v62 = vpop.f32.mrf.mxu2  ;;  %v247_v22 = vpop.f32.mrf.mxu3  ;;  %v264_v16 = vmax.f32 %v245_v23, 0.0 }
  0xa5   :  { %v236_v11 = vadd.f32 %v235_v62, %v670_v59  ;;  %v248_v27 = vadd.f32 %v247_v22, %v678_v12  ;;  %v400_v12 = vstv %s695_s4 }
  0xa6   :  { %v350_v59 = vpop.permute.xlu2 %349 }
  0xa7   :  { %v300_v25 = vpop.permute.xlu1 %299  ;;  %v295_v26 = vpop.permute.xlu0 %294  ;;  %v261_v15 = vmax.f32 %v236_v11, 0.0  ;;  %v265_v31 = vmax.f32 %v248_v27, 0.0 }
  0xa8   :  { %v364_v30 = vmul.f32 %v295_v26, %v252_v24  ;;  %v365_v32 = vmul.f32 %v300_v25, %v253_v28  ;;  %v263_v26 = vmax.f32 %v242_v18, 0.0 }
  0xaa   :  { %v379_v33 = vadd.f32 %v378_v29, %v364_v30  ;;  %v375_v28 = vmul.f32 %v350_v59, %v263_v26 }
  0xac   :  { %v380_v39 = vadd.f32 %v379_v33, %v365_v32 }
  0xae   :  { %v381_v48 = vadd.f32 %v380_v39, %v366_v41 }
  0xaf   :  { %v315_v44 = vpop.permute.xlu1 %314  ;;  %v310_v45 = vpop.permute.xlu0 %309 }
  0xb0   :  { %v367_v47 = vmul.f32 %v310_v45, %v255_v40  ;;  %v368_v51 = vmul.f32 %v315_v44, %v256_v46 }
  0xb2   :  { %v382_v52 = vadd.f32 %v381_v48, %v367_v47 }
  0xb4   :  { %v383_v54 = vadd.f32 %v382_v52, %v368_v51 }
  0xb6   :  { %v384_v8 = vadd.f32 %v383_v54, %v369_v61 }
  0xb7   :  { %v330_v63 = vpop.permute.xlu1 %329  ;;  %v325_v3 = vpop.permute.xlu0 %324 }
  0xb8   :  { %v370_v60 = vmul.f32 %v325_v3, %v258_v56  ;;  %v371_v55 = vmul.f32 %v330_v63, %v259_v4 }
  0xba   :  { %v385_v7 = vadd.f32 %v384_v8, %v370_v60 }
  0xbc   :  { %v386_v1 = vadd.f32 %v385_v7, %v371_v55 }
  0xbe   :  { %v387_v21 = vadd.f32 %v386_v1, %v372_v14 }
  0xbf   :  { %v345_v0 = vpop.permute.xlu1 %344  ;;  %v340_v17 = vpop.permute.xlu0 %339 }
  0xc0   :  { %v373_v20 = vmul.f32 %v340_v17, %v261_v15  ;;  %v374_v24 = vmul.f32 %v345_v0, %v262_v19 }
  0xc2   :  { %v388_v25 = vadd.f32 %v387_v21, %v373_v20 }
  0xc4   :  { %v389_v6 = vadd.f32 %v388_v25, %v374_v24 }
  0xc6   :  { %v390_v5 = vadd.f32 %v389_v6, %v375_v28 }
  0xc7   :  { %v360_v29 = vpop.permute.xlu1 %359  ;;  %v355_v30 = vpop.permute.xlu0 %354 }
  0xc8   :  { %v376_v32 = vmul.f32 %v355_v30, %v264_v16  ;;  %v377_v33 = vmul.f32 %v360_v29, %v265_v31 }
  0xca   :  { %v391_v34 = vadd.f32 %v390_v5, %v376_v32 }
  0xcc   :  { %v392_v35 = vadd.f32 %v391_v34, %v377_v33 }
  0xce   :  { %v393_v36 = vrot.slane %v392_v35, 4 }
  0xd0   :  { %v394_v37 = vadd.f32 %v393_v36, %v392_v35 }
  0xd2   :  { %v395_v2 = vrot.slane %v394_v37, 2 }
  0xd4   :  { %v396_v38 = vadd.f32 %v395_v2, %v394_v37 }
  0xd6   :  { %v397_v39 = vrot.slane %v396_v38, 1 }
  0xd8   :  { %v398_v40 = vadd.f32 %v397_v39, %v396_v38 }
  0xda   :  { %v401_v41 = vadd.f32 %v400_v12, %v398_v40 }
  0xdc   :  { %402 = vst [vmem:[#allocation3] sm:$0x1] %v401_v41 }
  0xdd   :  { %413 = dma.vmem_to_hbm [thread:$0]  %s409_s13, 16, %s411_s16, [#allocation4]  }
  0xde   :  { %470 = dma.done.wait [#allocation4], 16  }
  0xdf   :  { %471 = vsyncadd [#allocation4], 4294967280 }
  0xe0   :  { %418 = vsyncpa [#allocation4], 1 }

</bundles_post_ra>
